<compile_context>
chip_gen: v5e
topology: v5e:2x2
jax: 0.10.0
libtpu: 0.0.40
codegen_flags: <defaults>
</compile_context>

<pallas_src>
import functools

import jax
import jax.numpy as jnp
from jax import lax
from jax.experimental import pallas as pl
from jax.experimental.pallas import tpu as pltpu

MIN_PREC = 0.8
LAMBDA = 10000.0
NUM_CORES = 2   # leading "parallel" grid axis; matches v7x's 2 TCs, safe elsewhere


def _round_up(v, m):
    return ((v + m - 1) // m) * m


def _choose_tile_n(n, d, num_cores):
    """Lane-tile width: multiple of 128, big enough to amortize per-step cost,
    small enough that double-buffered x tiles never approach the VMEM limit."""
    sublanes = _round_up(max(d, 1), 8)
    # ~2 MiB per x buffer (double-buffered -> ~4 MiB): cap the column count.
    cap = (2 * 1024 * 1024) // (sublanes * 4)
    cap = max(512, min(131072, (cap // 128) * 128))
    need = _round_up(max(pl.cdiv(n, num_cores), 1), 128)
    return min(cap, max(128, need))


def _logreg_maxrecall_kernel(
    # scalar prefetch (SMEM)
    scalars_ref,   # f32[5]: mtilde, btilde, mhat, bhat, beta_bias
    nvalid_ref,    # i32[1]: true number of samples N
    # inputs (VMEM tiles)
    x_ref,         # (D, TILE_N)  feature-major sample tile
    y_ref,         # (1, TILE_N)  labels (zero-padded past N)
    beta_ref,      # (D, 1)       weight part of beta
    # outputs (per-core raw partial sums)
    tpc_ref,       # (1, 1, 1) sum_{y==1} sigmoid(mtilde*f + btilde)
    fpc_ref,       # (1, 1, 1) sum_{y==0} sigmoid(mhat*f + bhat)
    npl_ref,       # (1, 1, 1) sum(y)
    # VMEM scratch: per-lane partial sums (persist across the reduction axis)
    tpc_acc, fpc_acc, npl_acc,
):
    core = pl.program_id(0)
    step = pl.program_id(1)
    n_steps = pl.num_programs(1)
    tile_n = x_ref.shape[1]

    @pl.when(step == 0)
    def _init():
        tpc_acc[...] = jnp.zeros_like(tpc_acc)
        fpc_acc[...] = jnp.zeros_like(fpc_acc)
        npl_acc[...] = jnp.zeros_like(npl_acc)

    mtilde = scalars_ref[0]
    btilde = scalars_ref[1]
    mhat = scalars_ref[2]
    bhat = scalars_ref[3]
    beta_bias = scalars_ref[4]

    x = x_ref[...]            # (D, TILE_N)
    y = y_ref[...]            # (1, TILE_N)
    beta_w = beta_ref[...]    # (D, 1)

    # f = beta_w . x + bias, lane-dense (1, TILE_N): VPU multiply + sublane reduce.
    f = jnp.sum(x * beta_w, axis=0, keepdims=True) + beta_bias

    # Padding columns carry y == 0, so they can only pollute the negative
    # branch: mask only is_neg against the true sample count.
    col = (core * n_steps + step) * tile_n + lax.broadcasted_iota(
        jnp.int32, (1, tile_n), 1)
    valid = col < nvalid_ref[0]

    is_pos = y == 1.0                              # padding y==0 -> False
    is_neg = jnp.logical_and(valid, y == 0.0)      # needs explicit masking

    # One sigmoid per sample: branches are mutually exclusive, so select the
    # affine argument first, then a single EUP sigmoid.
    z = jnp.where(is_pos, mtilde * f + btilde, mhat * f + bhat)
    s = jax.nn.sigmoid(z)

    zero = jnp.zeros_like(s)
    tpc_acc[...] += jnp.where(is_pos, s, zero)
    fpc_acc[...] += jnp.where(is_neg, s, zero)
    npl_acc[...] += y                              # padding contributes 0

    @pl.when(step == n_steps - 1)
    def _finalize():
        tpc_ref[...] = jnp.reshape(
            jnp.sum(tpc_acc[...], axis=1, keepdims=True), (1, 1, 1))
        fpc_ref[...] = jnp.reshape(
            jnp.sum(fpc_acc[...], axis=1, keepdims=True), (1, 1, 1))
        npl_ref[...] = jnp.reshape(
            jnp.sum(npl_acc[...], axis=1, keepdims=True), (1, 1, 1))


@functools.partial(
    jax.jit, static_argnames=("min_prec", "lam", "tile_n", "num_cores"))
def logreg_maxrecall_loss(x, y, beta, gamma, delta, mtilde, btilde, mhat, bhat,
                          *, min_prec=MIN_PREC, lam=LAMBDA, tile_n=None,
                          num_cores=NUM_CORES):
    """x: (N, D), y: (N,) labels in {0,1}, beta: (D+1,) (last entry = bias)."""
    n, d = x.shape
    if tile_n is None:
        tile_n = _choose_tile_n(n, d, num_cores)

    tiles_per_core = pl.cdiv(pl.cdiv(n, tile_n), num_cores)
    n_pad = num_cores * tiles_per_core * tile_n

    # Feature-major layout: samples live on the lane axis. (Ideally x is stored
    # feature-major upstream; this transpose is one cheap pass over x.)
    x_t = jnp.asarray(x, jnp.float32).T                      # (D, N)
    y_row = jnp.asarray(y, jnp.float32).reshape(1, n)        # (1, N)
    if n_pad != n:
        x_t = jnp.pad(x_t, ((0, 0), (0, n_pad - n)))
        y_row = jnp.pad(y_row, ((0, 0), (0, n_pad - n)))     # pads with zeros

    beta = jnp.asarray(beta, jnp.float32)
    beta_w = beta[:d].reshape(d, 1)                          # (D, 1)
    scalars = jnp.concatenate([
        jnp.stack([
            jnp.asarray(mtilde, jnp.float32),
            jnp.asarray(btilde, jnp.float32),
            jnp.asarray(mhat, jnp.float32),
            jnp.asarray(bhat, jnp.float32),
        ]),
        beta[d:d + 1],                                        # bias term
    ])                                                        # f32[5]
    nvalid = jnp.array([n], dtype=jnp.int32)                  # i32[1]

    x_spec = pl.BlockSpec(
        (d, tile_n), lambda c, i, *_: (0, c * tiles_per_core + i))
    y_spec = pl.BlockSpec(
        (1, tile_n), lambda c, i, *_: (0, c * tiles_per_core + i))
    beta_spec = pl.BlockSpec((d, 1), lambda c, i, *_: (0, 0))
    part_spec = pl.BlockSpec((1, 1, 1), lambda c, i, *_: (c, 0, 0))
    part_shape = jax.ShapeDtypeStruct((num_cores, 1, 1), jnp.float32)

    tpc_p, fpc_p, npl_p = pl.pallas_call(
        _logreg_maxrecall_kernel,
        grid_spec=pltpu.PrefetchScalarGridSpec(
            num_scalar_prefetch=2,
            grid=(num_cores, tiles_per_core),
            in_specs=[x_spec, y_spec, beta_spec],
            out_specs=[part_spec, part_spec, part_spec],
            scratch_shapes=[pltpu.VMEM((1, tile_n), jnp.float32)] * 3,
        ),
        out_shape=(part_shape, part_shape, part_shape),
        compiler_params=pltpu.CompilerParams(
            dimension_semantics=("parallel", "arbitrary")),
    )(scalars, nvalid, x_t, y_row, beta_w)

    # Tiny nonlinear scalar tail (coef hoisted out of the per-element path).
    gamma = jnp.asarray(gamma, jnp.float32)
    delta = jnp.asarray(delta, jnp.float32)
    coef = 1.0 + gamma * delta
    tpc = coef * jnp.sum(tpc_p)
    fpc = coef * jnp.sum(fpc_p)
    nplus = jnp.sum(npl_p)
    g = -tpc + min_prec / (1.0 - min_prec) * fpc + gamma * delta * nplus
    return -tpc + lam * jnp.maximum(g, 0.0)


def reference_loss(x, y, beta, gamma, delta, mtilde, btilde, mhat, bhat,
                   min_prec=MIN_PREC, lam=LAMBDA):
    n = x.shape[0]
    x_aug = jnp.concatenate([x, jnp.ones((n, 1), dtype=jnp.float32)], axis=1)
    f = jnp.einsum("nd,d->n", x_aug, beta, precision=jax.lax.Precision.HIGHEST)
    coef = 1.0 + gamma * delta
    tpc = jnp.sum(jnp.where(y == 1.0, coef * jax.nn.sigmoid(mtilde * f + btilde), 0.0))
    fpc = jnp.sum(jnp.where(y == 0.0, coef * jax.nn.sigmoid(mhat * f + bhat), 0.0))
    nplus = jnp.sum(y)
    g = -tpc + min_prec / (1.0 - min_prec) * fpc + gamma * delta * nplus
    return -tpc + lam * jnp.maximum(g, 0.0)


if __name__ == "__main__":
    gamma, delta = 7.0, 0.035
    mtilde, btilde = 6.85, -3.54
    mhat, bhat = 6.85, 1.59

    key = jax.random.PRNGKey(0)
    ok = True
    # Small shapes consistent with the module (N samples, D features); the
    # second case exercises multiple grid steps, both cores and tail masking.
    for (N, D) in [(8, 4), (300, 6)]:
        key, kx, ky, kb = jax.random.split(key, 4)
        x = jax.random.normal(kx, (N, D), dtype=jnp.float32)
        y = jax.random.bernoulli(ky, 0.5, (N,)).astype(jnp.float32)
        # TODO(synk): the sklearn LogisticRegression warm-start in __init__ has
        # no Pallas equivalent; beta is initialized deterministically instead.
        beta = 0.1 * jax.random.normal(kb, (D + 1,), dtype=jnp.float32)

        loss = logreg_maxrecall_loss(
            x, y, beta, gamma, delta, mtilde, btilde, mhat, bhat)
        loss = jax.block_until_ready(loss)

        ref = reference_loss(x, y, beta, gamma, delta, mtilde, btilde, mhat, bhat)
        ok = ok and bool(jnp.allclose(loss, ref, rtol=1e-3, atol=1e-2))

    assert ok
    print("KERNEL_OK")
</pallas_src>

<mosaic_0001>
module attributes {stable_mosaic.version = 11 : i64} {
  func.func @_logreg_maxrecall_kernel(%arg0: i32, %arg1: i32, %arg2: memref<5xf32, #tpu.memory_space<smem>>, %arg3: memref<1xi32, #tpu.memory_space<smem>>, %arg4: memref<4x128xf32, #tpu.memory_space<vmem>>, %arg5: memref<1x128xf32, #tpu.memory_space<vmem>>, %arg6: memref<4x1xf32, #tpu.memory_space<vmem>>, %arg7: memref<1x1x1xf32, #tpu.memory_space<vmem>>, %arg8: memref<1x1x1xf32, #tpu.memory_space<vmem>>, %arg9: memref<1x1x1xf32, #tpu.memory_space<vmem>>, %arg10: memref<1x128xf32, #tpu.memory_space<vmem>>, %arg11: memref<1x128xf32, #tpu.memory_space<vmem>>, %arg12: memref<1x128xf32, #tpu.memory_space<vmem>>) attributes {dimension_semantics = [#tpu.dimension_semantics<parallel>, #tpu.dimension_semantics<arbitrary>], iteration_bounds = array<i64: 2, 1>, scalar_prefetch = 2 : i64, scratch_operands = 3 : i64, tpu.core_type = #tpu.core_type<tc>, window_params = [{transform_indices = @transform_0, window_bounds = array<i64: 4, 128>}, {transform_indices = @transform_1, window_bounds = array<i64: 1, 128>}, {pipeline_mode = #tpu.pipeline_mode<synchronous>, transform_indices = @transform_2, window_bounds = array<i64: 4, 1>}, {transform_indices = @transform_3, window_bounds = array<i64: 1, 1, 1>}, {transform_indices = @transform_4, window_bounds = array<i64: 1, 1, 1>}, {transform_indices = @transform_5, window_bounds = array<i64: 1, 1, 1>}]} {
    %c0_i32 = arith.constant 0 : i32
    %0 = arith.cmpi eq, %arg1, %c0_i32 : i32
    %1 = arith.extui %0 : i1 to i32
    %c0_i32_0 = arith.constant 0 : i32
    %2 = arith.cmpi ne, %1, %c0_i32_0 : i32
    scf.if %2 {
      %cst_26 = arith.constant 0.000000e+00 : f32
      %60 = vector.broadcast %cst_26 : f32 to vector<1x128xf32>
      %c0_27 = arith.constant 0 : index
      %c0_28 = arith.constant 0 : index
      %61 = vector.load %arg10[%c0_27, %c0_28] : memref<1x128xf32, #tpu.memory_space<vmem>>, vector<1x128xf32>
      tpu.vector_store %arg10[%c0_27, %c0_28], %60 {strides = array<i32>} : memref<1x128xf32, #tpu.memory_space<vmem>>, vector<1x128xf32>,
      %cst_29 = arith.constant 0.000000e+00 : f32
      %62 = vector.broadcast %cst_29 : f32 to vector<1x128xf32>
      %c0_30 = arith.constant 0 : index
      %c0_31 = arith.constant 0 : index
      %63 = vector.load %arg11[%c0_30, %c0_31] : memref<1x128xf32, #tpu.memory_space<vmem>>, vector<1x128xf32>
      tpu.vector_store %arg11[%c0_30, %c0_31], %62 {strides = array<i32>} : memref<1x128xf32, #tpu.memory_space<vmem>>, vector<1x128xf32>,
      %cst_32 = arith.constant 0.000000e+00 : f32
      %64 = vector.broadcast %cst_32 : f32 to vector<1x128xf32>
      %c0_33 = arith.constant 0 : index
      %c0_34 = arith.constant 0 : index
      %65 = vector.load %arg12[%c0_33, %c0_34] : memref<1x128xf32, #tpu.memory_space<vmem>>, vector<1x128xf32>
      tpu.vector_store %arg12[%c0_33, %c0_34], %64 {strides = array<i32>} : memref<1x128xf32, #tpu.memory_space<vmem>>, vector<1x128xf32>,
    } else {
    }
    %c0 = arith.constant 0 : index
    %3 = memref.load %arg2[%c0] : memref<5xf32, #tpu.memory_space<smem>>
    %c1 = arith.constant 1 : index
    %4 = memref.load %arg2[%c1] : memref<5xf32, #tpu.memory_space<smem>>
    %c2 = arith.constant 2 : index
    %5 = memref.load %arg2[%c2] : memref<5xf32, #tpu.memory_space<smem>>
    %c3 = arith.constant 3 : index
    %6 = memref.load %arg2[%c3] : memref<5xf32, #tpu.memory_space<smem>>
    %c4 = arith.constant 4 : index
    %7 = memref.load %arg2[%c4] : memref<5xf32, #tpu.memory_space<smem>>
    %c0_1 = arith.constant 0 : index
    %c0_2 = arith.constant 0 : index
    %8 = vector.load %arg4[%c0_1, %c0_2] : memref<4x128xf32, #tpu.memory_space<vmem>>, vector<4x128xf32>
    %c0_3 = arith.constant 0 : index
    %c0_4 = arith.constant 0 : index
    %9 = vector.load %arg5[%c0_3, %c0_4] : memref<1x128xf32, #tpu.memory_space<vmem>>, vector<1x128xf32>
    %c0_5 = arith.constant 0 : index
    %c0_6 = arith.constant 0 : index
    %10 = vector.load %arg6[%c0_5, %c0_6] : memref<4x1xf32, #tpu.memory_space<vmem>>, vector<4x1xf32>
    %11 = vector.broadcast %10 : vector<4x1xf32> to vector<4x128xf32>
    %12 = arith.mulf %8, %11 : vector<4x128xf32>
    %cst = arith.constant dense<0.000000e+00> : vector<128xf32>
    %13 = vector.multi_reduction <add>, %12, %cst [0] : vector<4x128xf32> to vector<128xf32>
    %14 = vector.shape_cast %13 : vector<128xf32> to vector<1x128xf32>
    %15 = vector.broadcast %7 : f32 to vector<1x128xf32>
    %16 = arith.addf %14, %15 : vector<1x128xf32>
    %c1_i32 = arith.constant 1 : i32
    %17 = arith.muli %arg0, %c1_i32 : i32
    %18 = arith.addi %17, %arg1 : i32
    %c128_i32 = arith.constant 128 : i32
    %19 = arith.muli %18, %c128_i32 : i32
    %20 = tpu.iota {dimensions = array<i32: 1>} : vector<1x128xi32>
    %21 = vector.broadcast %19 : i32 to vector<1x128xi32>
    %22 = arith.addi %21, %20 : vector<1x128xi32>
    %c0_7 = arith.constant 0 : index
    %23 = memref.load %arg3[%c0_7] : memref<1xi32, #tpu.memory_space<smem>>
    %24 = vector.broadcast %23 : i32 to vector<1x128xi32>
    %25 = arith.cmpi slt, %22, %24 : vector<1x128xi32>
    %cst_8 = arith.constant 1.000000e+00 : f32
    %26 = vector.broadcast %cst_8 : f32 to vector<1x128xf32>
    %27 = arith.cmpf oeq, %9, %26 : vector<1x128xf32>
    %cst_9 = arith.constant 0.000000e+00 : f32
    %28 = vector.broadcast %cst_9 : f32 to vector<1x128xf32>
    %29 = arith.cmpf oeq, %9, %28 : vector<1x128xf32>
    %30 = arith.andi %25, %29 : vector<1x128xi1>
    %31 = vector.broadcast %3 : f32 to vector<1x128xf32>
    %32 = arith.mulf %31, %16 : vector<1x128xf32>
    %33 = vector.broadcast %4 : f32 to vector<1x128xf32>
    %34 = arith.addf %32, %33 : vector<1x128xf32>
    %35 = vector.broadcast %5 : f32 to vector<1x128xf32>
    %36 = arith.mulf %35, %16 : vector<1x128xf32>
    %37 = vector.broadcast %6 : f32 to vector<1x128xf32>
    %38 = arith.addf %36, %37 : vector<1x128xf32>
    %39 = arith.select %27, %34, %38 : vector<1x128xi1>, vector<1x128xf32>
    %40 = arith.negf %39 : vector<1x128xf32>
    %41 = math.exp %40 : vector<1x128xf32>
    %cst_10 = arith.constant 1.000000e+00 : f32
    %42 = vector.broadcast %cst_10 : f32 to vector<1x128xf32>
    %43 = arith.addf %42, %41 : vector<1x128xf32>
    %44 = arith.divf %42, %43 : vector<1x128xf32>
    %cst_11 = arith.constant 0.000000e+00 : f32
    %45 = vector.broadcast %cst_11 : f32 to vector<1x128xf32>
    %c0_12 = arith.constant 0 : index
    %c0_13 = arith.constant 0 : index
    %46 = vector.load %arg10[%c0_12, %c0_13] : memref<1x128xf32, #tpu.memory_space<vmem>>, vector<1x128xf32>
    %47 = arith.select %27, %44, %45 : vector<1x128xi1>, vector<1x128xf32>
    %48 = arith.addf %46, %47 : vector<1x128xf32>
    %c0_14 = arith.constant 0 : index
    %c0_15 = arith.constant 0 : index
    %49 = vector.load %arg10[%c0_14, %c0_15] : memref<1x128xf32, #tpu.memory_space<vmem>>, vector<1x128xf32>
    tpu.vector_store %arg10[%c0_14, %c0_15], %48 {strides = array<i32>} : memref<1x128xf32, #tpu.memory_space<vmem>>, vector<1x128xf32>,
    %c0_16 = arith.constant 0 : index
    %c0_17 = arith.constant 0 : index
    %50 = vector.load %arg11[%c0_16, %c0_17] : memref<1x128xf32, #tpu.memory_space<vmem>>, vector<1x128xf32>
    %51 = arith.select %30, %44, %45 : vector<1x128xi1>, vector<1x128xf32>
    %52 = arith.addf %50, %51 : vector<1x128xf32>
    %c0_18 = arith.constant 0 : index
    %c0_19 = arith.constant 0 : index
    %53 = vector.load %arg11[%c0_18, %c0_19] : memref<1x128xf32, #tpu.memory_space<vmem>>, vector<1x128xf32>
    tpu.vector_store %arg11[%c0_18, %c0_19], %52 {strides = array<i32>} : memref<1x128xf32, #tpu.memory_space<vmem>>, vector<1x128xf32>,
    %c0_20 = arith.constant 0 : index
    %c0_21 = arith.constant 0 : index
    %54 = vector.load %arg12[%c0_20, %c0_21] : memref<1x128xf32, #tpu.memory_space<vmem>>, vector<1x128xf32>
    %55 = arith.addf %54, %9 : vector<1x128xf32>
    %c0_22 = arith.constant 0 : index
    %c0_23 = arith.constant 0 : index
    %56 = vector.load %arg12[%c0_22, %c0_23] : memref<1x128xf32, #tpu.memory_space<vmem>>, vector<1x128xf32>
    tpu.vector_store %arg12[%c0_22, %c0_23], %55 {strides = array<i32>} : memref<1x128xf32, #tpu.memory_space<vmem>>, vector<1x128xf32>,
    %c0_i32_24 = arith.constant 0 : i32
    %57 = arith.cmpi eq, %arg1, %c0_i32_24 : i32
    %58 = arith.extui %57 : i1 to i32
    %c0_i32_25 = arith.constant 0 : i32
    %59 = arith.cmpi ne, %58, %c0_i32_25 : i32
    scf.if %59 {
      %c0_26 = arith.constant 0 : index
      %c0_27 = arith.constant 0 : index
      %60 = vector.load %arg10[%c0_26, %c0_27] : memref<1x128xf32, #tpu.memory_space<vmem>>, vector<1x128xf32>
      %cst_28 = arith.constant dense<0.000000e+00> : vector<1xf32>
      %61 = vector.multi_reduction <add>, %60, %cst_28 [1] : vector<1x128xf32> to vector<1xf32>
      %62 = vector.shape_cast %61 : vector<1xf32> to vector<1x1xf32>
      %63 = vector.shape_cast %62 : vector<1x1xf32> to vector<1x1x1xf32>
      %c0_29 = arith.constant 0 : index
      %c0_30 = arith.constant 0 : index
      %c0_31 = arith.constant 0 : index
      %64 = vector.load %arg7[%c0_29, %c0_30, %c0_31] : memref<1x1x1xf32, #tpu.memory_space<vmem>>, vector<1x1x1xf32>
      tpu.vector_store %arg7[%c0_29, %c0_30, %c0_31], %63 {strides = array<i32>} : memref<1x1x1xf32, #tpu.memory_space<vmem>>, vector<1x1x1xf32>,
      %c0_32 = arith.constant 0 : index
      %c0_33 = arith.constant 0 : index
      %65 = vector.load %arg11[%c0_32, %c0_33] : memref<1x128xf32, #tpu.memory_space<vmem>>, vector<1x128xf32>
      %cst_34 = arith.constant dense<0.000000e+00> : vector<1xf32>
      %66 = vector.multi_reduction <add>, %65, %cst_34 [1] : vector<1x128xf32> to vector<1xf32>
      %67 = vector.shape_cast %66 : vector<1xf32> to vector<1x1xf32>
      %68 = vector.shape_cast %67 : vector<1x1xf32> to vector<1x1x1xf32>
      %c0_35 = arith.constant 0 : index
      %c0_36 = arith.constant 0 : index
      %c0_37 = arith.constant 0 : index
      %69 = vector.load %arg8[%c0_35, %c0_36, %c0_37] : memref<1x1x1xf32, #tpu.memory_space<vmem>>, vector<1x1x1xf32>
      tpu.vector_store %arg8[%c0_35, %c0_36, %c0_37], %68 {strides = array<i32>} : memref<1x1x1xf32, #tpu.memory_space<vmem>>, vector<1x1x1xf32>,
      %c0_38 = arith.constant 0 : index
      %c0_39 = arith.constant 0 : index
      %70 = vector.load %arg12[%c0_38, %c0_39] : memref<1x128xf32, #tpu.memory_space<vmem>>, vector<1x128xf32>
      %cst_40 = arith.constant dense<0.000000e+00> : vector<1xf32>
      %71 = vector.multi_reduction <add>, %70, %cst_40 [1] : vector<1x128xf32> to vector<1xf32>
      %72 = vector.shape_cast %71 : vector<1xf32> to vector<1x1xf32>
      %73 = vector.shape_cast %72 : vector<1x1xf32> to vector<1x1x1xf32>
      %c0_41 = arith.constant 0 : index
      %c0_42 = arith.constant 0 : index
      %c0_43 = arith.constant 0 : index
      %74 = vector.load %arg9[%c0_41, %c0_42, %c0_43] : memref<1x1x1xf32, #tpu.memory_space<vmem>>, vector<1x1x1xf32>
      tpu.vector_store %arg9[%c0_41, %c0_42, %c0_43], %73 {strides = array<i32>} : memref<1x1x1xf32, #tpu.memory_space<vmem>>, vector<1x1x1xf32>,
    } else {
    }
    return
  }
  func.func @transform_0(%arg0: i32, %arg1: i32, %arg2: memref<5xf32, #tpu.memory_space<smem>>, %arg3: memref<1xi32, #tpu.memory_space<smem>>) -> (i32, i32) {
    %c1_i32 = arith.constant 1 : i32
    %0 = arith.muli %arg0, %c1_i32 : i32
    %1 = arith.addi %0, %arg1 : i32
    %c0_i32 = arith.constant 0 : i32
    %c0_i32_0 = arith.constant 0 : i32
    return %c0_i32, %1 : i32, i32
  }
  func.func @transform_1(%arg0: i32, %arg1: i32, %arg2: memref<5xf32, #tpu.memory_space<smem>>, %arg3: memref<1xi32, #tpu.memory_space<smem>>) -> (i32, i32) {
    %c1_i32 = arith.constant 1 : i32
    %0 = arith.muli %arg0, %c1_i32 : i32
    %1 = arith.addi %0, %arg1 : i32
    %c0_i32 = arith.constant 0 : i32
    %c0_i32_0 = arith.constant 0 : i32
    return %c0_i32, %1 : i32, i32
  }
  func.func @transform_2(%arg0: i32, %arg1: i32, %arg2: memref<5xf32, #tpu.memory_space<smem>>, %arg3: memref<1xi32, #tpu.memory_space<smem>>) -> (i32, i32) {
    %c0_i32 = arith.constant 0 : i32
    %c0_i32_0 = arith.constant 0 : i32
    %c0_i32_1 = arith.constant 0 : i32
    return %c0_i32, %c0_i32_0 : i32, i32
  }
  func.func @transform_3(%arg0: i32, %arg1: i32, %arg2: memref<5xf32, #tpu.memory_space<smem>>, %arg3: memref<1xi32, #tpu.memory_space<smem>>) -> (i32, i32, i32) {
    %c0_i32 = arith.constant 0 : i32
    %c0_i32_0 = arith.constant 0 : i32
    %c0_i32_1 = arith.constant 0 : i32
    return %arg0, %c0_i32, %c0_i32_0 : i32, i32, i32
  }
  func.func @transform_4(%arg0: i32, %arg1: i32, %arg2: memref<5xf32, #tpu.memory_space<smem>>, %arg3: memref<1xi32, #tpu.memory_space<smem>>) -> (i32, i32, i32) {
    %c0_i32 = arith.constant 0 : i32
    %c0_i32_0 = arith.constant 0 : i32
    %c0_i32_1 = arith.constant 0 : i32
    return %arg0, %c0_i32, %c0_i32_0 : i32, i32, i32
  }
  func.func @transform_5(%arg0: i32, %arg1: i32, %arg2: memref<5xf32, #tpu.memory_space<smem>>, %arg3: memref<1xi32, #tpu.memory_space<smem>>) -> (i32, i32, i32) {
    %c0_i32 = arith.constant 0 : i32
    %c0_i32_0 = arith.constant 0 : i32
    %c0_i32_1 = arith.constant 0 : i32
    return %arg0, %c0_i32, %c0_i32_0 : i32, i32, i32
  }
}

</mosaic_0001>

<bundles_post_ra>
// kernel: logreg_maxrecall_loss.1
= control target key start
LH: loop header
LB: loop body
LE: loop exit
PB: predicated region body
PF: predicated region fallthrough
CT: control target
= control target key end

     0   :  { %s586_s29 = smov [#allocation6]   ;;  %s694_s0 = inlined_call_operand.vmem [shape: f32[5], index: 0, kind: input, shape index: {}]   ;;  %s695_s1 = inlined_call_operand.<no memory space> [shape: s32[1], index: 1, kind: input, shape index: {}]   ;;  %s696_s2 = inlined_call_operand.vmem [shape: f32[4,256], index: 2, kind: input, shape index: {}]   ;;  %s697_s3 = inlined_call_operand.vmem [shape: f32[1,256], index: 3, kind: input, shape index: {}]   ;;  %s698_s4 = inlined_call_operand.vmem [shape: f32[4,1], index: 4, kind: input, shape index: {}]   ;;  %s699_s5 = inlined_call_operand.vmem [shape: f32[2,1,1], index: 5, kind: output, shape index: {0}]   ;;  %s700_s6 = inlined_call_operand.vmem [shape: f32[2,1,1], index: 6, kind: output, shape index: {1}]   ;;  %s701_s7 = inlined_call_operand.vmem [shape: f32[2,1,1], index: 7, kind: output, shape index: {2}]  }
   0x1   :  { %s14_s26 = sshll.u32 %s694_s0, 4  ;;  %18 = sst [smem:[#allocation7]] %s695_s1  ;;  %s15_s26 = int_to_ptr.vmem [resolvable:$true] %s14_s26 }
   0x2   :  { %17 = dma.vmem_to_smem %s15_s26, 16, %s586_s29, [#allocation5] }
   0x3   :  { %572 = dma.done.wait [#allocation5], 16 }
   0x4   :  { %573 = vsyncadd [#allocation5], 4294967280 }
   0x5   :  { %21 = sfence }
   0x6   :  { %s635_s30 = smov 0   ;;  %s637_s8 = smov 0  }
   0x7   :  { %s639_s9 = smov 0  }
   0x8 LB: > { %s39_s0 = sadd.s32 1, %s580_s8  ;;  %p506_p0 = scmp.ge.s32.totalorder %s584_s9, 1  ;;  %s584_s9 = sphi %s639_s9, %s27_s9   ;;  %s580_s8 = sphi %s637_s8, %s703_s8   ;;  %s576_s30 = sphi %s635_s30, %s702_s30  }
   0x9   : > { %p41_p1 = scmp.ge.s32.totalorder %s39_s0, 2  ;;  %p230_p2 = scmp.lt.s32.totalorder %s584_s9, 3 }
   0xb   : > { %s705_s0 = smov (%p41_p1, %s39_s0), 0  ;;  %p231_p3 = pnand %p506_p0, %p230_p2 }
   0xc   : > { %p267_p4 = scmp.lt.s32.totalorder (!%p231_p3), %s576_s30, 1  ;;  %s511_s16 = sld [smem:[#allocation6 + $0x4]] (!%p231_p3) }
   0xd   : > { %234 = sbr.rel (%p231_p3) target bundleno = 323 (0x143), region = 32  ;;  %s293_s17 = sld [smem:[#allocation6]] (!%p231_p3) }
   0xe   : > { %s509_s18 = sld [smem:[#allocation6 + $0x2]] (!%p231_p3)  ;;  %s512_s25 = sshll.u32 (!%p231_p3), %s576_s30, 7 }
   0xf   : > { %s508_s19 = sld [smem:[#allocation6 + $0x1]] (!%p231_p3) }
  0x10   : > { %s510_s20 = sld [smem:[#allocation6 + $0x3]] (!%p231_p3) }
  0x11   : > { %s323_s24 = sld [smem:[#allocation7]] (!%p231_p3) }
  0x12   : > { %v300_v0 = vld [vmem:[%s698_s4] sm:$0xf]  ;;  %v587_v1 = vmov 0   ;;  %v588_v2 = vmov 0.0   ;;  %s660_s11 = scalar_select %p267_p4, %s576_s30, 1  ;;  %vm307_vm0 = vcmask 1043456   ;;  %v315_v12 = vstv %s511_s16 }
  0x13   : > { %543 = vset.pattern.permute.xlu0 %v587_v1  ;;  %290 = vst [vmem:[#allocation2] sm:$0x1] %v588_v2  ;;  %v329_v14 = vstv %s293_s17  ;;  %v319_v29 = vlaneseq  ;;  %v321_v32 = vstv %s512_s25  ;;  %vm372_vm9 = vcmask 1040384  }
  0x14   : > { %303 = vperm.xlu0 %543, %v300_v0   ;;  %291 = vst [vmem:[#allocation3] sm:$0x1] %v588_v2  ;;  %s507_s12 = sshll.u32 %s660_s11, 2  ;;  %s275_s23 = scalar_lea.vmem %s697_s3, %s660_s11  ;;  %v333_v15 = vstv %s509_s18  ;;  %vm376_vm10 = vcmask 0  }
  0x15   : > { %292 = vst [vmem:[#allocation4] sm:$0x1] %v588_v2  ;;  %s270_s15 = scalar_lea.vmem %s696_s2, %s507_s12  ;;  %v299_v16 = vld [vmem:[%s275_s23] sm:$0x1]  ;;  %v331_v18 = vstv %s508_s19  ;;  %v320_v31 = vand.u32 127, %v319_v29  ;;  %s279_s28 = scalar_lea.vmem %s699_s5, %s660_s11 }
  0x16   : > { %v298_v3 = vld [vmem:[%s270_s15] sm:$0xf]  ;;  %v335_v19 = vstv %s510_s20  ;;  %vm326_vm1 = vcmp.eq.f32.partialorder %v299_v16, 1.0  ;;  %vm327_vm3 = vcmp.eq.f32.partialorder %v299_v16, 0.0  ;;  %s282_s1 = scalar_lea.vmem %s700_s6, %s660_s11  ;;  %s285_s13 = scalar_lea.vmem %s701_s7, %s660_s11 }
  0x17   : > { %v322_v34 = vadd.s32 %v321_v32, %v320_v31  ;;  %v324_v35 = vstv %s323_s24 }
  0x19   : > { %vm325_vm2 = vcmp.lt.s32.totalorder %v322_v34, %v324_v35 }
  0x1a   : > { %vm328_vm5 = vmand %vm325_vm2, %vm327_vm3  ;;  %v357_v44 = vld [vmem:[#allocation2] sm:$0x1] }
  0x1b   : > { %v361_v45 = vld [vmem:[#allocation3] sm:$0x1] }
  0x1c   : > { %v365_v26 = vld [vmem:[#allocation4] sm:$0x1] }
  0x1d   : > { %v366_v27 = vadd.f32 %v365_v26, %v299_v16 }
  0x1f   : > { %367 = vst [vmem:[#allocation4] sm:$0x1] %v366_v27 }
  0x26   : > { %v383_v55 = vld [vmem:[#allocation4] sm:$0x1] }
  0x27   : > { %v384_v56 = vsel %vm372_vm9, %v383_v55, 0.0 }
  0x86   : > { %v304_v4 = vpop.permute.xlu0 %303 }
  0x87   : > { %v306_v5 = vmul.f32 %v304_v4, %v298_v3 }
  0x89   : > { %v308_v6 = vsel %vm307_vm0, %v306_v5, 0.0 }
  0x8a   : > { %v309_v7 = vrot.slane %v308_v6, 4 }
  0x8c   : > { %v310_v8 = vadd.f32 %v309_v7, %v308_v6 }
  0x8e   : > { %v311_v9 = vrot.slane %v310_v8, 2 }
  0x90   : > { %v312_v10 = vadd.f32 %v311_v9, %v310_v8 }
  0x92   : > { %v313_v11 = vrot.slane %v312_v10, 1 }
  0x94   : > { %v314_v13 = vadd.f32 %v313_v11, %v312_v10 }
  0x96   : > { %v316_v17 = vadd.f32 %v315_v12, %v314_v13 }
  0x98   : > { %v330_v20 = vmul.f32 %v329_v14, %v316_v17  ;;  %v334_v21 = vmul.f32 %v333_v15, %v316_v17 }
  0x9a   : > { %v332_v22 = vadd.f32 %v331_v18, %v330_v20  ;;  %v336_v23 = vadd.f32 %v335_v19, %v334_v21 }
  0x9c   : > { %v337_v24 = vsel %vm326_vm1, %v332_v22, %v336_v23 }
  0x9d   : > { %v513_v25 = vmul.f32 -1.442695, %v337_v24 }
  0x9f   : > { %544 = vpow2.f32 %v513_v25 }
  0xa5   : > { %v545_v28 = vpop.eup %544 }
  0xa6   : > { %v341_v30 = vadd.f32 1.0, %v545_v28 }
  0xa8   : > { %546 = vrcp.f32 %v341_v30  ;;  %v353_v38 = vand.u32 2147483648, %v341_v30  ;;  %v351_v40 = vand.u32 2147483647, %v341_v30  ;;  %vm347_vm6 = vweird.f32 %v341_v30 }
  0xaa   : > { %v354_v42 = vor.u32 1.1754944e-38, %v353_v38  ;;  %vm352_vm8 = vcmp.eq.f32.partialorder %v351_v40, 8.507059e+37 }
  0xae   : > { %v547_v33 = vpop.eup %546 }
  0xaf   : > { %v343_v36 = vmul.f32 %v547_v33, %v341_v30  ;;  %vm348_vm4 = vweird.f32 %v547_v33 }
  0xb0   : > { %vm349_vm7 = vmor %vm347_vm6, %vm348_vm4 }
  0xb1   : > { %v344_v37 = vsub.f32 1.0, %v343_v36 }
  0xb3   : > { %v345_v39 = vmul.f32 %v547_v33, %v344_v37 }
  0xb5   : > { %v346_v41 = vadd.f32 %v547_v33, %v345_v39 }
  0xb7   : > { %v350_v43 = vsel %vm349_vm7, %v547_v33, %v346_v41 }
  0xb8   : > { %v355_v46 = vsel %vm352_vm8, %v354_v42, %v350_v43 }
  0xb9   : > { %v358_v47 = vsel %vm326_vm1, %v355_v46, 0.0  ;;  %v362_v48 = vsel %vm328_vm5, %v355_v46, 0.0 }
  0xba   : > { %v359_v49 = vadd.f32 %v358_v47, %v357_v44  ;;  %v363_v50 = vadd.f32 %v362_v48, %v361_v45 }
  0xbc   : > { %360 = vst [vmem:[#allocation2] sm:$0x1] %v359_v49 }
  0xbd   : > { %364 = vst [vmem:[#allocation3] sm:$0x1] %v363_v50 }
  0xc3   : > { %v371_v51 = vld [vmem:[#allocation2] sm:$0x1] }
  0xc4   : > { %v378_v52 = vld [vmem:[#allocation3] sm:$0x1]  ;;  %v373_v53 = vsel %vm372_vm9, %v371_v51, 0.0 }
  0xc5   : > { %v379_v54 = vsel %vm372_vm9, %v378_v52, 0.0  ;;  %374 = vadd.xlane.f32.xlu0 %v373_v53 }
  0xc6   : > { %380 = vadd.xlane.f32.xlu1 %v379_v54 }
  0xce   : > { %385 = vadd.xlane.f32.xlu1 %v384_v56 }
 0x138   : > { %v375_v57 = vpop.xlane.xlu0 %374 }
 0x139   : > { %v381_v58 = vpop.xlane.xlu1 %380  ;;  %377 = vst.msk [vmem:[%s279_s28] sm:$0x1] %vm376_vm10, %v375_v57 }
 0x13a   : > { %382 = vst.msk [vmem:[%s282_s1] sm:$0x1] %vm376_vm10, %v381_v58 }
 0x141   : > { %v386_v59 = vpop.xlane.xlu1 %385 }
 0x142   : > { %387 = vst.msk [vmem:[%s285_s13] sm:$0x1] %vm376_vm10, %v386_v59 }
 0x143 PF: > { %s27_s9 = sadd.s32 1, %s584_s9   ;;  %s702_s30 = smov %s580_s8 }
 0x144   : > { %p24_p5 = scmp.ge.s32.totalorder %s27_s9, 4   ;;  %s703_s8 = smov %s705_s0 }
 0x146   :  { %26 = sbr.rel (!%p24_p5) target bundleno = 8 (0x8), region = 97 }

</bundles_post_ra>
